<compile_context>
chip_gen: v6e
topology: v6e:2x2x1
jax: 0.10.0
libtpu: 0.0.40
codegen_flags: <defaults>
</compile_context>

<pallas_src>
import numpy as np
import jax
import jax.numpy as jnp
from jax.experimental import pallas as pl
from jax.experimental.pallas import tpu as pltpu


# ----------------------------------------------------------------------------
# Host-side basis / weight construction (built once, NumPy, no per-call XLA ops)
# ----------------------------------------------------------------------------
def make_trend_basis_weights(degree: int, backcast_size: int, forecast_size: int):
    """Returns (wb, wf, backcast_basis, forecast_basis).

    wb: [2*cut, backcast_size]  -- rows [cut:] hold backcast_basis, rows [:cut] are 0
    wf: [2*cut, forecast_size]  -- rows [:cut] hold forecast_basis, rows [cut:] are 0
    so that   theta @ wb == theta[:, cut:] @ backcast_basis
              theta @ wf == theta[:, :cut] @ forecast_basis
    """
    cut = degree + 1

    def basis(size):
        t = np.linspace(0.0, 1.0, size, dtype=np.float32)          # [size]
        p = np.arange(cut, dtype=np.float32)[:, None]               # [cut, 1]
        return np.power(t[None, :], p).astype(np.float32)           # [cut, size]

    bb = basis(backcast_size)                                       # [cut, bsz]
    fb = basis(forecast_size)                                       # [cut, fsz]

    P = 2 * cut
    wb = np.zeros((P, backcast_size), np.float32)
    wb[cut:, :] = bb
    wf = np.zeros((P, forecast_size), np.float32)
    wf[:cut, :] = fb
    return jnp.asarray(wb), jnp.asarray(wf), jnp.asarray(bb), jnp.asarray(fb)


# ----------------------------------------------------------------------------
# Pallas kernel: two direct matmuls, one store per output ref.
# ----------------------------------------------------------------------------
def _trend_basis_kernel(theta_ref, wb_ref, wf_ref, bc_ref, fc_ref):
    th = theta_ref[...]
    bc_ref[...] = jnp.dot(th, wb_ref[...],
                          preferred_element_type=jnp.float32).astype(bc_ref.dtype)
    fc_ref[...] = jnp.dot(th, wf_ref[...],
                          preferred_element_type=jnp.float32).astype(fc_ref.dtype)


# ----------------------------------------------------------------------------
# Wrapper
# ----------------------------------------------------------------------------
_MAX_TILE_B = 8192  # rows; padded working set ~24 MiB at this size (see below)


def _pick_tile_b(B: int) -> int:
    if B > _MAX_TILE_B:
        return _MAX_TILE_B                      # multiple of 8, big enough to hide overhead
    # Large-but-fitting batches: split into 2 balanced steps so v7x megacore
    # can shard the "parallel" grid axis (needs >= 2 steps). Only when the
    # half-tile is a legal multiple of 8.
    if B >= 2048 and B % 16 == 0:
        return B // 2
    return B                                     # full-extent block dim is always legal


def trend_basis_forward(theta, wb, wf):
    """theta: [B, 2*(degree+1)] -> (backcast [B, bsz], forecast [B, fsz])."""
    B, P = theta.shape
    bsz = wb.shape[1]
    fsz = wf.shape[1]
    assert wb.shape[0] == P and wf.shape[0] == P

    tile_b = _pick_tile_b(B)
    grid = (pl.cdiv(B, tile_b),)

    # VMEM budget: f32 blocks pad their last dim to 128 lanes. theta + the two
    # output blocks, each double-buffered, plus resident weights / slack.
    pad = lambda n: ((n + 127) // 128) * 128
    row_bytes = (pad(P) + pad(bsz) + pad(fsz)) * 4
    vmem_need = 2 * tile_b * row_bytes + (1 << 20)
    vmem_limit = int(min(56 << 20, max(vmem_need, 16 << 20)))

    cost = pl.CostEstimate(
        flops=2 * B * P * (bsz + fsz),
        transcendentals=0,
        bytes_accessed=4 * (B * P + B * (bsz + fsz) + P * (bsz + fsz)),
    )

    backcast, forecast = pl.pallas_call(
        _trend_basis_kernel,
        out_shape=(jax.ShapeDtypeStruct((B, bsz), jnp.float32),
                   jax.ShapeDtypeStruct((B, fsz), jnp.float32)),
        grid=grid,
        in_specs=[
            pl.BlockSpec((tile_b, P), lambda i: (i, 0)),   # theta batch tile
            pl.BlockSpec((P, bsz), lambda i: (0, 0)),      # resident backcast weight
            pl.BlockSpec((P, fsz), lambda i: (0, 0)),      # resident forecast weight
        ],
        out_specs=(
            pl.BlockSpec((tile_b, bsz), lambda i: (i, 0)),
            pl.BlockSpec((tile_b, fsz), lambda i: (i, 0)),
        ),
        compiler_params=pltpu.CompilerParams(
            dimension_semantics=("parallel",),             # megacore sharding on v7x
            vmem_limit_bytes=vmem_limit,
        ),
        cost_estimate=cost,
    )(theta, wb, wf)

    return backcast, forecast


# ----------------------------------------------------------------------------
# Pure-JAX reference (mirrors the PyTorch forward exactly)
# ----------------------------------------------------------------------------
def reference_forward(theta, backcast_basis, forecast_basis, *, degree):
    cut = degree + 1
    backcast = jnp.einsum("bp,pt->bt", theta[:, cut:], backcast_basis)
    forecast = jnp.einsum("bp,pt->bt", theta[:, :cut], forecast_basis)
    return backcast, forecast


if __name__ == "__main__":
    batch = 2
    degree = 3
    backcast_size = 16
    forecast_size = 8
    theta_size = 2 * (degree + 1)   # 8 coefficients: 4 forecast + 4 backcast

    key = jax.random.PRNGKey(0)
    theta = jax.random.normal(key, (batch, theta_size), jnp.float32)

    wb, wf, bb, fb = make_trend_basis_weights(degree, backcast_size, forecast_size)

    backcast, forecast = trend_basis_forward(theta, wb, wf)
    jax.block_until_ready((backcast, forecast))

    bc_ref, fc_ref = reference_forward(theta, bb, fb, degree=degree)
    np.testing.assert_allclose(np.asarray(backcast), np.asarray(bc_ref),
                               rtol=1e-5, atol=1e-5)
    np.testing.assert_allclose(np.asarray(forecast), np.asarray(fc_ref),
                               rtol=1e-5, atol=1e-5)

    print("KERNEL_OK")
</pallas_src>

<mosaic_0001>
module attributes {stable_mosaic.version = 11 : i64} {
  func.func @_trend_basis_kernel(%arg0: i32, %arg1: memref<2x8xf32, #tpu.memory_space<vmem>>, %arg2: memref<8x16xf32, #tpu.memory_space<vmem>>, %arg3: memref<8x8xf32, #tpu.memory_space<vmem>>, %arg4: memref<2x16xf32, #tpu.memory_space<vmem>>, %arg5: memref<2x8xf32, #tpu.memory_space<vmem>>) attributes {dimension_semantics = [#tpu.dimension_semantics<parallel>], iteration_bounds = array<i64: 1>, scalar_prefetch = 0 : i64, scratch_operands = 0 : i64, tpu.core_type = #tpu.core_type<tc>, window_params = [{transform_indices = @transform_0, window_bounds = array<i64: 2, 8>}, {pipeline_mode = #tpu.pipeline_mode<synchronous>, transform_indices = @transform_1, window_bounds = array<i64: 8, 16>}, {pipeline_mode = #tpu.pipeline_mode<synchronous>, transform_indices = @transform_2, window_bounds = array<i64: 8, 8>}, {transform_indices = @transform_3, window_bounds = array<i64: 2, 16>}, {transform_indices = @transform_4, window_bounds = array<i64: 2, 8>}]} {
    %c0 = arith.constant 0 : index
    %c0_0 = arith.constant 0 : index
    %0 = vector.load %arg1[%c0, %c0_0] : memref<2x8xf32, #tpu.memory_space<vmem>>, vector<2x8xf32>
    %c0_1 = arith.constant 0 : index
    %c0_2 = arith.constant 0 : index
    %1 = vector.load %arg2[%c0_1, %c0_2] : memref<8x16xf32, #tpu.memory_space<vmem>>, vector<8x16xf32>
    %cst = arith.constant dense<0.000000e+00> : vector<2x16xf32>
    %2 = tpu.matmul %0, %1, %cst {dimension_numbers = #tpu.dot_dimension_numbers<[1], [0], [0], [1], [0, 0, 1, 1], [], []>} : vector<2x8xf32>, vector<8x16xf32>, vector<2x16xf32> -> vector<2x16xf32>
    %c0_3 = arith.constant 0 : index
    %c0_4 = arith.constant 0 : index
    %3 = vector.load %arg4[%c0_3, %c0_4] : memref<2x16xf32, #tpu.memory_space<vmem>>, vector<2x16xf32>
    tpu.vector_store %arg4[%c0_3, %c0_4], %2 {strides = array<i32>} : memref<2x16xf32, #tpu.memory_space<vmem>>, vector<2x16xf32>,
    %c0_5 = arith.constant 0 : index
    %c0_6 = arith.constant 0 : index
    %4 = vector.load %arg3[%c0_5, %c0_6] : memref<8x8xf32, #tpu.memory_space<vmem>>, vector<8x8xf32>
    %cst_7 = arith.constant dense<0.000000e+00> : vector<2x8xf32>
    %5 = tpu.matmul %0, %4, %cst_7 {dimension_numbers = #tpu.dot_dimension_numbers<[1], [0], [0], [1], [0, 0, 1, 1], [], []>} : vector<2x8xf32>, vector<8x8xf32>, vector<2x8xf32> -> vector<2x8xf32>
    %c0_8 = arith.constant 0 : index
    %c0_9 = arith.constant 0 : index
    %6 = vector.load %arg5[%c0_8, %c0_9] : memref<2x8xf32, #tpu.memory_space<vmem>>, vector<2x8xf32>
    tpu.vector_store %arg5[%c0_8, %c0_9], %5 {strides = array<i32>} : memref<2x8xf32, #tpu.memory_space<vmem>>, vector<2x8xf32>,
    return
  }
  func.func @transform_0(%arg0: i32) -> (i32, i32) {
    %c0_i32 = arith.constant 0 : i32
    %c0_i32_0 = arith.constant 0 : i32
    return %arg0, %c0_i32 : i32, i32
  }
  func.func @transform_1(%arg0: i32) -> (i32, i32) {
    %c0_i32 = arith.constant 0 : i32
    %c0_i32_0 = arith.constant 0 : i32
    %c0_i32_1 = arith.constant 0 : i32
    return %c0_i32, %c0_i32_0 : i32, i32
  }
  func.func @transform_2(%arg0: i32) -> (i32, i32) {
    %c0_i32 = arith.constant 0 : i32
    %c0_i32_0 = arith.constant 0 : i32
    %c0_i32_1 = arith.constant 0 : i32
    return %c0_i32, %c0_i32_0 : i32, i32
  }
  func.func @transform_3(%arg0: i32) -> (i32, i32) {
    %c0_i32 = arith.constant 0 : i32
    %c0_i32_0 = arith.constant 0 : i32
    return %arg0, %c0_i32 : i32, i32
  }
  func.func @transform_4(%arg0: i32) -> (i32, i32) {
    %c0_i32 = arith.constant 0 : i32
    %c0_i32_0 = arith.constant 0 : i32
    return %arg0, %c0_i32 : i32, i32
  }
}

</mosaic_0001>

<bundles_post_ra>
// kernel: tpu_custom_call.1
= control target key start
LH: loop header
LB: loop body
LE: loop exit
PB: predicated region body
PF: predicated region fallthrough
CT: control target
= control target key end

     0   :  { %10 = vsyncpa [#allocation3], 0  ;;  %s412_s0 = inlined_call_operand.hbm [shape: f32[2,8], index: 0, kind: input, shape index: {}]   ;;  %s413_s1 = inlined_call_operand.hbm [shape: f32[8,16], index: 1, kind: input, shape index: {}]   ;;  %s414_s2 = inlined_call_operand.hbm [shape: f32[8,8], index: 2, kind: input, shape index: {}]   ;;  %s415_s3 = inlined_call_operand.hbm [shape: f32[2,16], index: 3, kind: output, shape index: {0}]   ;;  %s416_s4 = inlined_call_operand.hbm [shape: f32[2,8], index: 4, kind: output, shape index: {1}]  }
   0x1   :  { %11 = vsyncpa [#allocation6], 0 }
   0x2   :  { %12 = vsyncpa [#allocation4], 0 }
   0x3   :  { %13 = vsyncpa [#allocation10], 0  ;;  %s365_s15 = smov [#allocation5]   ;;  %s366_s17 = smov [#allocation2]  }
   0x4   :  { %s30_s16 = sshll.u32 %s365_s15, 4  ;;  %s20_s18 = sshll.u32 %s366_s17, 4  ;;  %s31_s16 = int_to_ptr.vmem [resolvable:$true] %s30_s16  ;;  %s21_s18 = int_to_ptr.vmem [resolvable:$true] %s20_s18 }
   0x5   :  { %s265_s19 = scalar_lea.vmem %s31_s16, 128  ;;  %p270_p1 = scmp.lt.s32.totalorder %s31_s16, %s31_s16 }
   0x6   :  { %p266_p0 = scmp.ne.s32.totalorder %s31_s16, %s265_s19  ;;  %p271_p2 = scmp.lt.s32.totalorder %s265_s19, %s265_s19 }
   0x8   :  { %p272_p3 = por %p271_p2, %p270_p1 }
   0xa   :  { %p273_p4 = pnand %p272_p3, %p266_p0 }
   0xc   :  { %276 = shalt.err (!%p273_p4)
}
   0xd   :  { %33 = dma.hbm_to_vmem [thread:$0]  %s413_s1, 128, %s31_s16, [#allocation6]  }
   0xe   :  { %s285_s22 = scalar_lea.vmem %s21_s18, 32  ;;  %p290_p6 = scmp.lt.s32.totalorder %s21_s18, %s21_s18 }
   0xf   :  { %p286_p5 = scmp.ne.s32.totalorder %s21_s18, %s285_s22  ;;  %p291_p7 = scmp.lt.s32.totalorder %s285_s22, %s285_s22 }
  0x11   :  { %p292_p8 = por %p291_p7, %p290_p6 }
  0x13   :  { %p293_p9 = pnand %p292_p8, %p286_p5 }
  0x15   :  { %296 = shalt.err (!%p293_p9)
}
  0x16   :  { %23 = dma.hbm_to_vmem [thread:$0]  %s412_s0, 32, %s21_s18, [#allocation3]  }
  0x17   :  { %s367_s25 = smov [#allocation7]  }
  0x18   :  { %s40_s26 = sshll.u32 %s367_s25, 4  ;;  %s41_s26 = int_to_ptr.vmem [resolvable:$true] %s40_s26 }
  0x19   :  { %s305_s27 = scalar_lea.vmem %s41_s26, 128  ;;  %p310_p11 = scmp.lt.s32.totalorder %s41_s26, %s41_s26 }
  0x1a   :  { %p306_p10 = scmp.ne.s32.totalorder %s41_s26, %s305_s27  ;;  %p311_p12 = scmp.lt.s32.totalorder %s305_s27, %s305_s27 }
  0x1c   :  { %p312_p13 = por %p311_p12, %p310_p11 }
  0x1e   :  { %p313_p0 = pnand %p312_p13, %p306_p10 }
  0x20   :  { %316 = shalt.err (!%p313_p0)
}
  0x21   :  { %43 = dma.hbm_to_vmem [thread:$0]  %s414_s2, 128, %s41_s26, [#allocation6]  }
  0x22   :  { %357 = dma.done.wait [#allocation3], 32  }
  0x23   :  { %358 = vsyncadd [#allocation3], 4294967264 }
  0x24   :  { %359 = dma.done.wait [#allocation6], 256  }
  0x25   :  { %360 = vsyncadd [#allocation6], 4294967040  ;;  %v368_v0 = vmov 0.0   ;;  %vm369_vm0 = vmmov 0   ;;  %vm55_vm1 = vcmask 64512   ;;  %v54_v1 = vld [vmem:[#allocation5] sm:$0xff] }
  0x26   :  { %240 = vmatprep.subr.mxu0 %v368_v0  ;;  %245 = vmatprep.subr.mxu1 %v368_v0  ;;  %v131_v2 = vld [vmem:[#allocation7] sm:$0xff]  ;;  %v53_v3 = vld [vmem:[#allocation2] sm:$0x3]  ;;  %s370_s0 = smov [#allocation8]   ;;  %s371_s29 = smov [#allocation9]   ;;  %vm129_vm2 = vcmask 123904  }
  0x27   :  { %242 = vmatprep.mubr.msk.f32.mxu0 %vm369_vm0, %v368_v0  ;;  %247 = vmatprep.mubr.msk.f32.mxu1 %vm369_vm0, %v368_v0  ;;  %s210_s2 = sshll.u32 %s370_s0, 4  ;;  %s220_s30 = sshll.u32 %s371_s29, 4  ;;  %vm202_vm3 = vcmask 58368   ;;  %s211_s2 = int_to_ptr.vmem [resolvable:$true] %s210_s2  ;;  %s221_s30 = int_to_ptr.vmem [resolvable:$true] %s220_s30 }
  0x28   :  { %241 = vmatpush3.msra.mxu0 %v54_v1  ;;  %246 = vmatpush3.msra.mxu1 %v131_v2  ;;  %s317_s5 = scalar_lea.vmem %s211_s2, 32  ;;  %p322_p2 = scmp.lt.s32.totalorder %s211_s2, %s211_s2 }
  0x29   :  { %243 = vmatmul.mubr.msk.f32.vlgmr.msra.gmra.mxu0 %vm55_vm1, %v53_v3  ;;  %248 = vmatmul.mubr.msk.f32.vlgmr.msra.gmra.mxu1 %vm55_vm1, %v53_v3  ;;  %p318_p1 = scmp.ne.s32.totalorder %s211_s2, %s317_s5  ;;  %p323_p3 = scmp.lt.s32.totalorder %s317_s5, %s317_s5 }
  0x2b   :  { %p324_p4 = por %p323_p3, %p322_p2 }
  0x2d   :  { %p325_p5 = pnand %p324_p4, %p318_p1 }
  0xe9   :  { %v125_v4 = vpop.f32.mrf.mxu0  ;;  %v198_v5 = vpop.f32.mrf.mxu1 }
  0xea   :  { %130 = vst.msk [vmem:[#allocation8] sm:$0x3] %vm129_vm2, %v125_v4 }
  0xeb   :  { %203 = vst.msk [vmem:[#allocation9] sm:$0x3] %vm202_vm3, %v198_v5  ;;  %v244_v6 = vpop.f32.mrf.mxu0  ;;  %v249_v7 = vpop.f32.mrf.mxu1 }
  0xec   :  { %328 = shalt.err (!%p325_p5)
}
  0xed   :  { %213 = dma.vmem_to_hbm [thread:$0]  %s211_s2, 32, %s415_s3, [#allocation4]  }
  0xee   :  { %s337_s8 = scalar_lea.vmem %s221_s30, 32  ;;  %p342_p7 = scmp.lt.s32.totalorder %s221_s30, %s221_s30 }
  0xef   :  { %p338_p6 = scmp.ne.s32.totalorder %s221_s30, %s337_s8  ;;  %p343_p8 = scmp.lt.s32.totalorder %s337_s8, %s337_s8 }
  0xf1   :  { %p344_p9 = por %p343_p8, %p342_p7 }
  0xf3   :  { %p345_p10 = pnand %p344_p9, %p338_p6 }
  0xf5   :  { %348 = shalt.err (!%p345_p10)
}
  0xf6   :  { %223 = dma.vmem_to_hbm [thread:$0]  %s221_s30, 32, %s416_s4, [#allocation10]  }
  0xf7   :  { %361 = dma.done.wait [#allocation4], 32  }
  0xf8   :  { %362 = vsyncadd [#allocation4], 4294967264 }
  0xf9   :  { %363 = dma.done.wait [#allocation10], 32  }
  0xfa   :  { %364 = vsyncadd [#allocation10], 4294967264 }
  0xfb   :  { %230 = vsyncpa [#allocation3], 1 }
  0xfc   :  { %231 = vsyncpa [#allocation6], 1 }
  0xfd   :  { %232 = vsyncpa [#allocation4], 1 }
  0xfe   :  { %233 = vsyncpa [#allocation10], 1 }

</bundles_post_ra>
